<compile_context>
chip_gen: v6e
topology: v6e:2x2x1
jax: 0.10.0
libtpu: 0.0.40
codegen_flags: <defaults>
</compile_context>

<pallas_src>
import math

import jax
import jax.numpy as jnp
from jax import lax
from jax.experimental import pallas as pl
from jax.experimental.pallas import tpu as pltpu


def _round_up(v, m):
    return (v + m - 1) // m * m


def _device_kind():
    try:
        devs = jax.devices()
        return devs[0].device_kind.lower() if devs else ""
    except Exception:
        return ""


def _physical_vmem_bytes():
    try:
        info = pltpu.get_tpu_info()
        v = getattr(info, "vmem_capacity_bytes", None)
        if v:
            return int(v)
    except Exception:
        pass
    return 64 * 1024 * 1024      # conservative fallback (v7x per-core VMEM)


def _pick_query_tile(sp):
    # v6e/v7x MXU is 2x256^2: a 256-row LHS fills it and halves the number of
    # grid steps / weight-writeback DMAs. v5e's MXU is 128-wide -> keep 128.
    kind = _device_kind()
    if ("v6" in kind or "v7" in kind) and sp % 256 == 0:
        return 256
    return 128


def _derive_vmem_limit(sp, dp, tq, has_mask, has_key_bias):
    """Scoped-VMEM limit derived from actual buffer sizes (not hard-coded),
    clamped to 90% of this chip's physical VMEM."""
    f32 = 4
    demand = 0
    demand += 2 * sp * dp * f32                        # x block (<= 2 buffers)
    demand += (dp * dp + dp * 2 * dp + 3 * dp) * f32   # resident weights/bias
    demand += 2 * sp * dp * f32                        # K + V scratch
    demand += 2 * tq * dp * f32                        # S out (double buffered)
    demand += 2 * tq * sp * f32                        # weights out (double buf)
    if has_mask:
        demand += 2 * tq * sp                          # int8 mask block
    if has_key_bias:
        demand += sp * f32                             # key-pad bias row
    demand += 3 * tq * sp * f32 + 2 * tq * dp * f32    # live f32 temporaries
    limit = int(demand * 1.5) + (8 << 20)              # compiler headroom
    limit = max(limit, 32 << 20)
    return min(limit, int(_physical_vmem_bytes() * 0.9))


def _make_attention_kernel(*, has_mask, has_key_bias, inv_sqrt_dk, dp, tq):
    """Grid = (B, Sp // Tq). At query-tile 0 of each batch element the fused
    K/V projection x @ [Wk^T | Wv^T] + [bk | bv] is written into two separate
    VMEM scratch buffers; every query tile then recomputes its own (Tq, Dp)
    Q block from the resident x slab (Tq*Dp*Dp MACs -- negligible next to the
    two Tq*Sp*Dp attention matmuls)."""

    def kernel(*refs):
        if has_mask:
            (x_ref, wq_ref, bq_ref, wkv_ref, bkv_ref, mask_ref,
             s_out_ref, w_out_ref, k_s, v_s) = refs
            kb_ref = None
        elif has_key_bias:
            (x_ref, wq_ref, bq_ref, wkv_ref, bkv_ref, kb_ref,
             s_out_ref, w_out_ref, k_s, v_s) = refs
            mask_ref = None
        else:
            (x_ref, wq_ref, bq_ref, wkv_ref, bkv_ref,
             s_out_ref, w_out_ref, k_s, v_s) = refs
            mask_ref = kb_ref = None

        qi = pl.program_id(1)

        # Fused K/V projection, once per batch element, into separate
        # directly-addressable scratch buffers (Q is NOT kept resident).
        @pl.when(qi == 0)
        def _():
            kv = (jnp.dot(x_ref[0], wkv_ref[...],
                          preferred_element_type=jnp.float32)
                  + bkv_ref[...])                              # (Sp, 2*Dp)
            k_s[...] = kv[:, :dp]
            v_s[...] = kv[:, dp:]

        # Per-tile Q from the resident x block; scale Q here (Tq*Dp multiplies
        # instead of Tq*Sp on the scores).
        row0 = pl.multiple_of(qi * tq, tq)
        x_rows = x_ref[0, pl.ds(row0, tq), :]                  # (Tq, Dp)
        q = (jnp.dot(x_rows, wq_ref[...],
                     preferred_element_type=jnp.float32)
             + bq_ref[...]) * inv_sqrt_dk                      # (Tq, Dp)

        # Q @ K^T: contract last dims directly, no materialized transpose.
        scores = lax.dot_general(
            q, k_s[...], dimension_numbers=(((1,), (1,)), ((), ())),
            preferred_element_type=jnp.float32)                # (Tq, Sp)

        if has_mask:
            # int8 mask compared directly -- no int32 unpack on the VALU.
            scores = jnp.where(mask_ref[0] != 0, scores, jnp.float32(-1e9))
        elif has_key_bias:
            # Precomputed {0, -1e9} row: one broadcast add for padded keys.
            scores = scores + kb_ref[...]

        # Numerically stable softmax along the key axis (matches torch).
        m = jnp.max(scores, axis=-1, keepdims=True)
        e = jnp.exp(scores - m)
        denom = jnp.sum(e, axis=-1, keepdims=True)
        # EUP approximate reciprocal + one Newton-Raphson refinement step:
        # frees VPU slots while staying well inside the 1e-5 parity tolerance.
        r = pl.reciprocal(denom, approx=True)
        r = r * (2.0 - denom * r)
        w = e * r

        s_out_ref[0] = jnp.dot(w, v_s[...], preferred_element_type=jnp.float32)
        w_out_ref[0] = w

    return kernel


@jax.jit
def attention_forward(x, w_q, b_q, w_k, b_k, w_v, b_v, mask=None):
    """x: (B, S, D) f32. w_*: (D, D) in PyTorch nn.Linear layout (out, in).
    b_*: (D,). mask: optional (B, S, S); entries == 0 are masked out.
    Returns (S, weights) with the exact semantics of Attention.forward."""
    B, S, D = x.shape
    inv_sqrt_dk = 1.0 / math.sqrt(D)          # d_k = input.size(2) = d_model

    # Lane-dense padding (multiples of 128) -> unmasked vector stores;
    # skipped entirely when the shapes are already aligned.
    Sp = _round_up(S, 128)
    Dp = _round_up(D, 128)
    Tq = _pick_query_tile(Sp)
    nq = Sp // Tq
    f32 = jnp.float32

    x = x.astype(f32)
    x_p = x if (Sp == S and Dp == D) else jnp.pad(
        x, ((0, 0), (0, Sp - S), (0, Dp - D)))

    def pad_wT(w):   # torch (out, in) -> transposed, zero-padded (Dp, Dp)
        w = w.T.astype(f32)
        return w if Dp == D else jnp.pad(w, ((0, Dp - D), (0, Dp - D)))

    def pad_b(b):
        b = b.astype(f32)
        return b if Dp == D else jnp.pad(b, (0, Dp - D))

    wq_t = pad_wT(w_q)
    bq_row = pad_b(b_q).reshape(1, Dp)
    # Fused K/V projection weights: x @ [Wk^T | Wv^T] + [bk | bv].
    wkv = jnp.concatenate([pad_wT(w_k), pad_wT(w_v)], axis=1)       # (Dp, 2Dp)
    bkv = jnp.concatenate([pad_b(b_k), pad_b(b_v)]).reshape(1, 2 * Dp)

    has_mask = mask is not None
    has_key_bias = (not has_mask) and (S < Sp)

    # Constant-per-call operands: one buffer, no double-buffering VMEM waste.
    def const_spec(shape):
        return pl.BlockSpec(shape, lambda b, q: (0,) * len(shape),
                            pipeline_mode=pl.Buffered(1))

    # x changes only on the (outer) batch axis; on v7x (64 MiB VMEM) drop its
    # second buffer -- the once-per-batch exposed DMA hides behind the large
    # per-batch K/V projection matmul. Keep double-buffering on v5e/v6e.
    if "v7" in _device_kind():
        x_spec = pl.BlockSpec((1, Sp, Dp), lambda b, q: (b, 0, 0),
                              pipeline_mode=pl.Buffered(1))
    else:
        x_spec = pl.BlockSpec((1, Sp, Dp), lambda b, q: (b, 0, 0))

    inputs = [x_p, wq_t, bq_row, wkv, bkv]
    in_specs = [x_spec,
                const_spec((Dp, Dp)),          # Wq^T
                const_spec((1, Dp)),           # bq
                const_spec((Dp, 2 * Dp)),      # [Wk^T | Wv^T]
                const_spec((1, 2 * Dp))]       # [bk | bv]

    if has_mask:
        # (mask != 0) first so non-binary/float masks keep torch semantics,
        # then int8 for 4x less HBM/VMEM traffic. Padded key columns / query
        # rows are padded with 0 (== masked) so they never get softmax weight.
        keep = (mask != 0)
        if Sp != S:
            keep = jnp.pad(keep, ((0, 0), (0, Sp - S), (0, Sp - S)))
        inputs.append(keep.astype(jnp.int8))
        in_specs.append(pl.BlockSpec((1, Tq, Sp), lambda b, q: (b, q, 0)))
    elif has_key_bias:
        # Additive {0, -1e9} bias row neutralizing padded key columns.
        kb = jnp.where(jnp.arange(Sp) < S, 0.0, -1e9).astype(f32).reshape(1, Sp)
        inputs.append(kb)
        in_specs.append(const_spec((1, Sp)))

    kernel = _make_attention_kernel(
        has_mask=has_mask, has_key_bias=has_key_bias,
        inv_sqrt_dk=inv_sqrt_dk, dp=Dp, tq=Tq)

    s_p, w_p = pl.pallas_call(
        kernel,
        out_shape=(jax.ShapeDtypeStruct((B, Sp, Dp), f32),
                   jax.ShapeDtypeStruct((B, Sp, Sp), f32)),
        grid_spec=pltpu.PrefetchScalarGridSpec(
            num_scalar_prefetch=0,
            grid=(B, nq),
            in_specs=in_specs,
            out_specs=[
                pl.BlockSpec((1, Tq, Dp), lambda b, q: (b, q, 0)),   # S
                pl.BlockSpec((1, Tq, Sp), lambda b, q: (b, q, 0)),   # weights
            ],
            scratch_shapes=[pltpu.VMEM((Sp, Dp), f32),               # K
                            pltpu.VMEM((Sp, Dp), f32)],              # V
        ),
        compiler_params=pltpu.CompilerParams(
            dimension_semantics=("parallel", "arbitrary"),
            vmem_limit_bytes=_derive_vmem_limit(
                Sp, Dp, Tq, has_mask, has_key_bias)),
    )(*inputs)

    # Strip padding (glue only); numerics identical to the PyTorch module.
    return s_p[:, :S, :D], w_p[:, :S, :S]


def _reference(x, w_q, b_q, w_k, b_k, w_v, b_v, mask=None):
    D = x.shape[-1]
    Q = jnp.einsum("bsd,ed->bse", x, w_q) + b_q
    K = jnp.einsum("bsd,ed->bse", x, w_k) + b_k
    V = jnp.einsum("bsd,ed->bse", x, w_v) + b_v
    scores = jnp.einsum("bqd,bkd->bqk", Q, K) / math.sqrt(D)
    if mask is not None:
        scores = jnp.where(mask == 0, jnp.float32(-1e9), scores)
    w = jax.nn.softmax(scores, axis=-1)
    return jnp.einsum("bqk,bkd->bqd", w, V), w


if __name__ == "__main__":
    B, S, D = 2, 8, 32  # batch=2, seq=8, d_model=32

    key = jax.random.PRNGKey(0)
    kx, kq, kk, kv, kbq, kbk, kbv = jax.random.split(key, 7)

    x = jax.random.normal(kx, (B, S, D), dtype=jnp.float32)

    # Deterministic PyTorch-Linear-style init: U(-1/sqrt(D), 1/sqrt(D)).
    bound = 1.0 / math.sqrt(D)
    w_q = jax.random.uniform(kq, (D, D), jnp.float32, -bound, bound)
    w_k = jax.random.uniform(kk, (D, D), jnp.float32, -bound, bound)
    w_v = jax.random.uniform(kv, (D, D), jnp.float32, -bound, bound)
    b_q = jax.random.uniform(kbq, (D,), jnp.float32, -bound, bound)
    b_k = jax.random.uniform(kbk, (D,), jnp.float32, -bound, bound)
    b_v = jax.random.uniform(kbv, (D,), jnp.float32, -bound, bound)

    # --- no-mask path (padded-key bias row, no mask input at all) -----------
    s_out, w_out = attention_forward(x, w_q, b_q, w_k, b_k, w_v, b_v, mask=None)
    jax.block_until_ready((s_out, w_out))
    s_ref, w_ref = _reference(x, w_q, b_q, w_k, b_k, w_v, b_v)
    assert jnp.allclose(s_out, s_ref, atol=1e-5, rtol=1e-5)
    assert jnp.allclose(w_out, w_ref, atol=1e-5, rtol=1e-5)

    # --- masked path (causal mask: every row keeps >= 1 key) ----------------
    causal = jnp.tril(jnp.ones((S, S), dtype=jnp.int32))
    mask = jnp.broadcast_to(causal, (B, S, S))
    s_out_m, w_out_m = attention_forward(x, w_q, b_q, w_k, b_k, w_v, b_v,
                                         mask=mask)
    jax.block_until_ready((s_out_m, w_out_m))
    s_ref_m, w_ref_m = _reference(x, w_q, b_q, w_k, b_k, w_v, b_v, mask=mask)
    assert jnp.allclose(s_out_m, s_ref_m, atol=1e-5, rtol=1e-5)
    assert jnp.allclose(w_out_m, w_ref_m, atol=1e-5, rtol=1e-5)

    print("KERNEL_OK")
</pallas_src>

<mosaic_0001>
module attributes {stable_mosaic.version = 11 : i64} {
  func.func @kernel(%arg0: i32, %arg1: i32, %arg2: memref<1x128x128xf32, #tpu.memory_space<vmem>>, %arg3: memref<128x128xf32, #tpu.memory_space<vmem>>, %arg4: memref<1x128xf32, #tpu.memory_space<vmem>>, %arg5: memref<128x256xf32, #tpu.memory_space<vmem>>, %arg6: memref<1x256xf32, #tpu.memory_space<vmem>>, %arg7: memref<1x128xf32, #tpu.memory_space<vmem>>, %arg8: memref<1x128x128xf32, #tpu.memory_space<vmem>>, %arg9: memref<1x128x128xf32, #tpu.memory_space<vmem>>, %arg10: memref<128x128xf32, #tpu.memory_space<vmem>>, %arg11: memref<128x128xf32, #tpu.memory_space<vmem>>) attributes {dimension_semantics = [#tpu.dimension_semantics<parallel>, #tpu.dimension_semantics<arbitrary>], iteration_bounds = array<i64: 2, 1>, scalar_prefetch = 0 : i64, scratch_operands = 2 : i64, tpu.core_type = #tpu.core_type<tc>, window_params = [{transform_indices = @transform_0, window_bounds = array<i64: 1, 128, 128>}, {pipeline_mode = #tpu.pipeline_mode<synchronous>, transform_indices = @transform_1, window_bounds = array<i64: 128, 128>}, {pipeline_mode = #tpu.pipeline_mode<synchronous>, transform_indices = @transform_2, window_bounds = array<i64: 1, 128>}, {pipeline_mode = #tpu.pipeline_mode<synchronous>, transform_indices = @transform_3, window_bounds = array<i64: 128, 256>}, {pipeline_mode = #tpu.pipeline_mode<synchronous>, transform_indices = @transform_4, window_bounds = array<i64: 1, 256>}, {pipeline_mode = #tpu.pipeline_mode<synchronous>, transform_indices = @transform_5, window_bounds = array<i64: 1, 128>}, {transform_indices = @transform_6, window_bounds = array<i64: 1, 128, 128>}, {transform_indices = @transform_7, window_bounds = array<i64: 1, 128, 128>}]} {
    %c0_i32 = arith.constant 0 : i32
    %0 = arith.cmpi eq, %arg1, %c0_i32 : i32
    %1 = arith.extui %0 : i1 to i32
    %c0_i32_0 = arith.constant 0 : i32
    %2 = arith.cmpi ne, %1, %c0_i32_0 : i32
    scf.if %2 {
      %c0_24 = arith.constant 0 : index
      %c0_25 = arith.constant 0 : index
      %c0_26 = arith.constant 0 : index
      %42 = vector.load %arg2[%c0_24, %c0_25, %c0_26] : memref<1x128x128xf32, #tpu.memory_space<vmem>>, vector<1x128x128xf32>
      %43 = vector.shape_cast %42 : vector<1x128x128xf32> to vector<128x128xf32>
      %c0_27 = arith.constant 0 : index
      %c0_28 = arith.constant 0 : index
      %44 = vector.load %arg5[%c0_27, %c0_28] : memref<128x256xf32, #tpu.memory_space<vmem>>, vector<128x256xf32>
      %cst_29 = arith.constant dense<0.000000e+00> : vector<128x256xf32>
      %45 = tpu.matmul %43, %44, %cst_29 {dimension_numbers = #tpu.dot_dimension_numbers<[1], [0], [0], [1], [0, 0, 1, 1], [], []>} : vector<128x128xf32>, vector<128x256xf32>, vector<128x256xf32> -> vector<128x256xf32>
      %c0_30 = arith.constant 0 : index
      %c0_31 = arith.constant 0 : index
      %46 = vector.load %arg6[%c0_30, %c0_31] : memref<1x256xf32, #tpu.memory_space<vmem>>, vector<1x256xf32>
      %47 = vector.broadcast %46 : vector<1x256xf32> to vector<128x256xf32>
      %48 = arith.addf %45, %47 : vector<128x256xf32>
      %49 = vector.extract_strided_slice %48 {offsets = [0, 0], sizes = [128, 128], strides = [1, 1]} : vector<128x256xf32> to vector<128x128xf32>
      %c0_32 = arith.constant 0 : index
      %c0_33 = arith.constant 0 : index
      %50 = vector.load %arg10[%c0_32, %c0_33] : memref<128x128xf32, #tpu.memory_space<vmem>>, vector<128x128xf32>
      tpu.vector_store %arg10[%c0_32, %c0_33], %49 {strides = array<i32>} : memref<128x128xf32, #tpu.memory_space<vmem>>, vector<128x128xf32>,
      %51 = vector.extract_strided_slice %48 {offsets = [0, 128], sizes = [128, 128], strides = [1, 1]} : vector<128x256xf32> to vector<128x128xf32>
      %c0_34 = arith.constant 0 : index
      %c0_35 = arith.constant 0 : index
      %52 = vector.load %arg11[%c0_34, %c0_35] : memref<128x128xf32, #tpu.memory_space<vmem>>, vector<128x128xf32>
      tpu.vector_store %arg11[%c0_34, %c0_35], %51 {strides = array<i32>} : memref<128x128xf32, #tpu.memory_space<vmem>>, vector<128x128xf32>,
    } else {
    }
    %c128_i32 = arith.constant 128 : i32
    %3 = arith.muli %arg1, %c128_i32 : i32
    %4 = tpu.assume_multiple %3, 128 : i32
    %c0 = arith.constant 0 : index
    %5 = arith.index_cast %4 : i32 to index
    %c0_1 = arith.constant 0 : index
    %6 = vector.load %arg2[%c0, %5, %c0_1] : memref<1x128x128xf32, #tpu.memory_space<vmem>>, vector<1x128x128xf32>
    %7 = vector.shape_cast %6 : vector<1x128x128xf32> to vector<128x128xf32>
    %c0_2 = arith.constant 0 : index
    %c0_3 = arith.constant 0 : index
    %8 = vector.load %arg3[%c0_2, %c0_3] : memref<128x128xf32, #tpu.memory_space<vmem>>, vector<128x128xf32>
    %cst = arith.constant dense<0.000000e+00> : vector<128x128xf32>
    %9 = tpu.matmul %7, %8, %cst {dimension_numbers = #tpu.dot_dimension_numbers<[1], [0], [0], [1], [0, 0, 1, 1], [], []>} : vector<128x128xf32>, vector<128x128xf32>, vector<128x128xf32> -> vector<128x128xf32>
    %c0_4 = arith.constant 0 : index
    %c0_5 = arith.constant 0 : index
    %10 = vector.load %arg4[%c0_4, %c0_5] : memref<1x128xf32, #tpu.memory_space<vmem>>, vector<1x128xf32>
    %11 = vector.broadcast %10 : vector<1x128xf32> to vector<128x128xf32>
    %12 = arith.addf %9, %11 : vector<128x128xf32>
    %cst_6 = arith.constant 0.176776692 : f32
    %13 = vector.broadcast %cst_6 : f32 to vector<128x128xf32>
    %14 = arith.mulf %12, %13 : vector<128x128xf32>
    %c0_7 = arith.constant 0 : index
    %c0_8 = arith.constant 0 : index
    %15 = vector.load %arg10[%c0_7, %c0_8] : memref<128x128xf32, #tpu.memory_space<vmem>>, vector<128x128xf32>
    %cst_9 = arith.constant dense<0.000000e+00> : vector<128x128xf32>
    %16 = tpu.matmul %14, %15, %cst_9 {dimension_numbers = #tpu.dot_dimension_numbers<[1], [1], [0], [0], [0, 0, 1, 0], [], []>} : vector<128x128xf32>, vector<128x128xf32>, vector<128x128xf32> -> vector<128x128xf32>
    %c0_10 = arith.constant 0 : index
    %c0_11 = arith.constant 0 : index
    %17 = vector.load %arg7[%c0_10, %c0_11] : memref<1x128xf32, #tpu.memory_space<vmem>>, vector<1x128xf32>
    %18 = vector.broadcast %17 : vector<1x128xf32> to vector<128x128xf32>
    %19 = arith.addf %16, %18 : vector<128x128xf32>
    %cst_12 = arith.constant dense<0xFF800000> : vector<128xf32>
    %20 = vector.multi_reduction <maximumf>, %19, %cst_12 [1] : vector<128x128xf32> to vector<128xf32>
    %21 = vector.shape_cast %20 : vector<128xf32> to vector<128x1xf32>
    %22 = vector.broadcast %21 : vector<128x1xf32> to vector<128x128xf32>
    %23 = arith.subf %19, %22 : vector<128x128xf32>
    %24 = math.exp %23 : vector<128x128xf32>
    %cst_13 = arith.constant dense<0.000000e+00> : vector<128xf32>
    %25 = vector.multi_reduction <add>, %24, %cst_13 [1] : vector<128x128xf32> to vector<128xf32>
    %26 = vector.shape_cast %25 : vector<128xf32> to vector<128x1xf32>
    %27 = tpu.reciprocal %26 {approx = true} : vector<128x1xf32> -> vector<128x1xf32>
    %28 = arith.mulf %26, %27 : vector<128x1xf32>
    %cst_14 = arith.constant 2.000000e+00 : f32
    %29 = vector.broadcast %cst_14 : f32 to vector<128x1xf32>
    %30 = arith.subf %29, %28 : vector<128x1xf32>
    %31 = arith.mulf %27, %30 : vector<128x1xf32>
    %32 = vector.broadcast %31 : vector<128x1xf32> to vector<128x128xf32>
    %33 = arith.mulf %24, %32 : vector<128x128xf32>
    %c0_15 = arith.constant 0 : index
    %c0_16 = arith.constant 0 : index
    %34 = vector.load %arg11[%c0_15, %c0_16] : memref<128x128xf32, #tpu.memory_space<vmem>>, vector<128x128xf32>
    %cst_17 = arith.constant dense<0.000000e+00> : vector<128x128xf32>
    %35 = tpu.matmul %33, %34, %cst_17 {dimension_numbers = #tpu.dot_dimension_numbers<[1], [0], [0], [1], [0, 0, 1, 1], [], []>} : vector<128x128xf32>, vector<128x128xf32>, vector<128x128xf32> -> vector<128x128xf32>
    %c0_18 = arith.constant 0 : index
    %c0_19 = arith.constant 0 : index
    %c0_20 = arith.constant 0 : index
    %36 = vector.load %arg8[%c0_18, %c0_19, %c0_20] : memref<1x128x128xf32, #tpu.memory_space<vmem>>, vector<1x128x128xf32>
    %37 = vector.shape_cast %36 : vector<1x128x128xf32> to vector<128x128xf32>
    %38 = vector.shape_cast %35 : vector<128x128xf32> to vector<1x128x128xf32>
    tpu.vector_store %arg8[%c0_18, %c0_19, %c0_20], %38 {strides = array<i32>} : memref<1x128x128xf32, #tpu.memory_space<vmem>>, vector<1x128x128xf32>,
    %c0_21 = arith.constant 0 : index
    %c0_22 = arith.constant 0 : index
    %c0_23 = arith.constant 0 : index
    %39 = vector.load %arg9[%c0_21, %c0_22, %c0_23] : memref<1x128x128xf32, #tpu.memory_space<vmem>>, vector<1x128x128xf32>
    %40 = vector.shape_cast %39 : vector<1x128x128xf32> to vector<128x128xf32>
    %41 = vector.shape_cast %33 : vector<128x128xf32> to vector<1x128x128xf32>
    tpu.vector_store %arg9[%c0_21, %c0_22, %c0_23], %41 {strides = array<i32>} : memref<1x128x128xf32, #tpu.memory_space<vmem>>, vector<1x128x128xf32>,
    return
  }
  func.func @transform_0(%arg0: i32, %arg1: i32) -> (i32, i32, i32) {
    %c0_i32 = arith.constant 0 : i32
    %c0_i32_0 = arith.constant 0 : i32
    %c0_i32_1 = arith.constant 0 : i32
    return %arg0, %c0_i32, %c0_i32_0 : i32, i32, i32
  }
  func.func @transform_1(%arg0: i32, %arg1: i32) -> (i32, i32) {
    %c0_i32 = arith.constant 0 : i32
    %c0_i32_0 = arith.constant 0 : i32
    %c0_i32_1 = arith.constant 0 : i32
    return %c0_i32, %c0_i32_0 : i32, i32
  }
  func.func @transform_2(%arg0: i32, %arg1: i32) -> (i32, i32) {
    %c0_i32 = arith.constant 0 : i32
    %c0_i32_0 = arith.constant 0 : i32
    %c0_i32_1 = arith.constant 0 : i32
    return %c0_i32, %c0_i32_0 : i32, i32
  }
  func.func @transform_3(%arg0: i32, %arg1: i32) -> (i32, i32) {
    %c0_i32 = arith.constant 0 : i32
    %c0_i32_0 = arith.constant 0 : i32
    %c0_i32_1 = arith.constant 0 : i32
    return %c0_i32, %c0_i32_0 : i32, i32
  }
  func.func @transform_4(%arg0: i32, %arg1: i32) -> (i32, i32) {
    %c0_i32 = arith.constant 0 : i32
    %c0_i32_0 = arith.constant 0 : i32
    %c0_i32_1 = arith.constant 0 : i32
    return %c0_i32, %c0_i32_0 : i32, i32
  }
  func.func @transform_5(%arg0: i32, %arg1: i32) -> (i32, i32) {
    %c0_i32 = arith.constant 0 : i32
    %c0_i32_0 = arith.constant 0 : i32
    %c0_i32_1 = arith.constant 0 : i32
    return %c0_i32, %c0_i32_0 : i32, i32
  }
  func.func @transform_6(%arg0: i32, %arg1: i32) -> (i32, i32, i32) {
    %c0_i32 = arith.constant 0 : i32
    %c0_i32_0 = arith.constant 0 : i32
    return %arg0, %arg1, %c0_i32 : i32, i32, i32
  }
  func.func @transform_7(%arg0: i32, %arg1: i32) -> (i32, i32, i32) {
    %c0_i32 = arith.constant 0 : i32
    %c0_i32_0 = arith.constant 0 : i32
    return %arg0, %arg1, %c0_i32 : i32, i32, i32
  }
}

</mosaic_0001>

<bundles_post_ra>
// kernel: attention_forward.1
= control target key start
LH: loop header
LB: loop body
LE: loop exit
PB: predicated region body
PF: predicated region fallthrough
CT: control target
= control target key end

     0   :  { %s1907_s24 = smov 0   ;;  %s1909_s25 = smov 0   ;;  %s2367_s0 = inlined_call_operand.vmem [shape: f32[2,128,128], index: 0, kind: input, shape index: {}]   ;;  %s2368_s1 = inlined_call_operand.vmem [shape: f32[128,128], index: 1, kind: input, shape index: {}]   ;;  %s2369_s2 = inlined_call_operand.vmem [shape: f32[1,128], index: 2, kind: input, shape index: {}]   ;;  %s2370_s3 = inlined_call_operand.vmem [shape: f32[128,256], index: 3, kind: input, shape index: {}]   ;;  %s2371_s4 = inlined_call_operand.vmem [shape: f32[1,256], index: 4, kind: input, shape index: {}]   ;;  %s2372_s5 = inlined_call_operand.vmem [shape: f32[1,128], index: 5, kind: input, shape index: {}]   ;;  %s2373_s6 = inlined_call_operand.vmem [shape: f32[2,128,128], index: 6, kind: output, shape index: {0}]   ;;  %s2374_s7 = inlined_call_operand.vmem [shape: f32[2,128,128], index: 7, kind: output, shape index: {1}]  }
   0x1   :  { %s1911_s26 = smov 0  }
   0x2 LB: > { %s30_s27 = sadd.s32 1, %s1860_s25  ;;  %p1475_p0 = scmp.ge.s32.totalorder %s1864_s26, 1  ;;  %s1864_s26 = sphi %s1911_s26, %s18_s26   ;;  %s1860_s25 = sphi %s1909_s25, %s2376_s25   ;;  %s1856_s24 = sphi %s1907_s24, %s2375_s24  }
   0x3   : > { %p32_p1 = scmp.ge.s32.totalorder %s30_s27, 2  ;;  %p256_p2 = scmp.lt.s32.totalorder %s1864_s26, 3 }
   0x5   : > { %s2378_s27 = smov (%p32_p1, %s30_s27), 0  ;;  %p257_p3 = pnand %p1475_p0, %p256_p2 }
   0x6   : > { %p301_p4 = scmp.lt.s32.totalorder (!%p257_p3), %s1856_s24, 1 }
   0x7   : > { %260 = sbr.rel (%p257_p3) target bundleno = 1106 (0x452), region = 44 }
   0xc   : > { %v377_v0 = vld [vmem:[%s2370_s3 + $0xf8] sm:$0xff]  ;;  %v376_v1 = vld [vmem:[%s2370_s3 + $0xf0] sm:$0xff]  ;;  %v375_v2 = vld [vmem:[%s2370_s3 + $0xe8] sm:$0xff]  ;;  %v1866_v4 = vmov 0.0   ;;  %s2380_s24 = smov (!%p301_p4, %s1856_s24), 1 }
   0xd   : > { %390 = vmatprep.subr.mxu0 %v377_v0  ;;  %v374_v3 = vld [vmem:[%s2370_s3 + $0xe0] sm:$0xff]  ;;  %454 = vmatprep.mubr.f32.mxu0 %v1866_v4  ;;  %v373_v5 = vld [vmem:[%s2370_s3 + $0xd8] sm:$0xff]  ;;  %v372_v6 = vld [vmem:[%s2370_s3 + $0xd0] sm:$0xff]  ;;  %s1947_s19 = sshll.u32 %s2380_s24, 7 }
   0xe   : > { %391 = vmatpush1.msra.mxu0 %v376_v1  ;;  %v371_v7 = vld [vmem:[%s2370_s3 + $0xc8] sm:$0xff]  ;;  %v370_v8 = vld [vmem:[%s2370_s3 + $0xc0] sm:$0xff]  ;;  %v369_v9 = vld [vmem:[%s2370_s3 + $0xb8] sm:$0xff]  ;;  %s1962_s24 = scalar_lea.vmem %s2367_s0, %s1947_s19  ;;  %s2302_s21 = scalar_lea.vmem %s2374_s7, %s1947_s19 }
   0xf   : > { %392 = vmatprep.subr.mxu0 %v375_v2  ;;  %v368_v10 = vld [vmem:[%s2370_s3 + $0xb0] sm:$0xff]  ;;  %v367_v11 = vld [vmem:[%s2370_s3 + $0xa8] sm:$0xff]  ;;  %v366_v12 = vld [vmem:[%s2370_s3 + $0xa0] sm:$0xff]  ;;  %s2340_s28 = scalar_lea.vmem %s2373_s6, %s1947_s19 }
  0x10   : > { %393 = vmatpush1.msra.mxu0 %v374_v3  ;;  %v365_v13 = vld [vmem:[%s2370_s3 + $0x98] sm:$0xff]  ;;  %v1974_v14 = vld [vmem:[%s1962_s24] sm:$0xff]  ;;  %v364_v15 = vld [vmem:[%s2370_s3 + $0x90] sm:$0xff] }
  0x11   : > { %394 = vmatprep.subr.mxu0 %v373_v5  ;;  %1617 = vmatprep.mubr.f32.mxu1 %v1974_v14  ;;  %v363_v16 = vld [vmem:[%s2370_s3 + $0x88] sm:$0xff]  ;;  %v362_v17 = vld [vmem:[%s2370_s3 + $0x80] sm:$0xff]  ;;  %v361_v18 = vld [vmem:[%s2370_s3 + $0x78] sm:$0xff] }
  0x12   : > { %395 = vmatpush1.msra.mxu0 %v372_v6  ;;  %v360_v19 = vld [vmem:[%s2370_s3 + $0x70] sm:$0xff]  ;;  %v359_v20 = vld [vmem:[%s2370_s3 + $0x68] sm:$0xff]  ;;  %v616_v21 = vld [vmem:[%s2368_s1 + $0x78] sm:$0xff] }
  0x13   : > { %396 = vmatprep.subr.mxu0 %v371_v7  ;;  %v615_v22 = vld [vmem:[%s2368_s1 + $0x70] sm:$0xff]  ;;  %v358_v23 = vld [vmem:[%s2370_s3 + $0x60] sm:$0xff]  ;;  %1585 = vmatprep.subr.mxu1 %v616_v21  ;;  %v357_v24 = vld [vmem:[%s2370_s3 + $0x58] sm:$0xff] }
  0x14   : > { %397 = vmatpush1.msra.mxu0 %v370_v8  ;;  %1586 = vmatpush3.msra.mxu1 %v616_v21  ;;  %v614_v25 = vld [vmem:[%s2368_s1 + $0x68] sm:$0xff]  ;;  %v356_v26 = vld [vmem:[%s2370_s3 + $0x50] sm:$0xff]  ;;  %v613_v28 = vld [vmem:[%s2368_s1 + $0x60] sm:$0xff] }
  0x15   : > { %398 = vmatprep.subr.mxu0 %v369_v9  ;;  %1587 = vmatprep.subr.mxu1 %v615_v22  ;;  %v355_v27 = vld [vmem:[%s2370_s3 + $0x48] sm:$0xff]  ;;  %v354_v29 = vld [vmem:[%s2370_s3 + $0x40] sm:$0xff]  ;;  %v353_v30 = vld [vmem:[%s2370_s3 + $0x38] sm:$0xff] }
  0x16   : > { %399 = vmatpush1.msra.mxu0 %v368_v10  ;;  %1588 = vmatpush3.msra.mxu1 %v615_v22  ;;  %v612_v31 = vld [vmem:[%s2368_s1 + $0x58] sm:$0xff]  ;;  %v352_v32 = vld [vmem:[%s2370_s3 + $0x30] sm:$0xff]  ;;  %v351_v33 = vld [vmem:[%s2370_s3 + $0x28] sm:$0xff] }
  0x17   : > { %400 = vmatprep.subr.mxu0 %v367_v11  ;;  %1589 = vmatprep.subr.mxu1 %v614_v25  ;;  %v611_v34 = vld [vmem:[%s2368_s1 + $0x50] sm:$0xff]  ;;  %v350_v35 = vld [vmem:[%s2370_s3 + $0x20] sm:$0xff]  ;;  %v349_v36 = vld [vmem:[%s2370_s3 + $0x18] sm:$0xff] }
  0x18   : > { %401 = vmatpush1.msra.mxu0 %v366_v12  ;;  %1590 = vmatpush3.msra.mxu1 %v614_v25  ;;  %v610_v37 = vld [vmem:[%s2368_s1 + $0x48] sm:$0xff]  ;;  %v348_v38 = vld [vmem:[%s2370_s3 + $0x10] sm:$0xff]  ;;  %v609_v40 = vld [vmem:[%s2368_s1 + $0x40] sm:$0xff] }
  0x19   : > { %402 = vmatprep.subr.mxu0 %v365_v13  ;;  %1591 = vmatprep.subr.mxu1 %v613_v28  ;;  %v347_v39 = vld [vmem:[%s2370_s3 + $0x8] sm:$0xff]  ;;  %v346_v41 = vld [vmem:[%s2370_s3] sm:$0xff]  ;;  %v608_v42 = vld [vmem:[%s2368_s1 + $0x38] sm:$0xff] }
  0x1a   : > { %403 = vmatpush1.msra.mxu0 %v364_v15  ;;  %1592 = vmatpush3.msra.mxu1 %v613_v28  ;;  %v607_v43 = vld [vmem:[%s2368_s1 + $0x30] sm:$0xff]  ;;  %v331_v44 = vld [vmem:[%s1962_s24 + $0x8] sm:$0xff]  ;;  %v605_v46 = vld [vmem:[%s2368_s1 + $0x20] sm:$0xff] }
  0x1b   : > { %404 = vmatprep.subr.mxu0 %v363_v16  ;;  %1593 = vmatprep.subr.mxu1 %v612_v31  ;;  %v606_v45 = vld [vmem:[%s2368_s1 + $0x28] sm:$0xff]  ;;  %v332_v47 = vld [vmem:[%s1962_s24 + $0x10] sm:$0xff]  ;;  %v604_v48 = vld [vmem:[%s2368_s1 + $0x18] sm:$0xff] }
  0x1c   : > { %405 = vmatpush1.msra.mxu0 %v362_v17  ;;  %1594 = vmatpush3.msra.mxu1 %v612_v31  ;;  %v603_v49 = vld [vmem:[%s2368_s1 + $0x10] sm:$0xff]  ;;  %v333_v50 = vld [vmem:[%s1962_s24 + $0x18] sm:$0xff]  ;;  %v602_v51 = vld [vmem:[%s2368_s1 + $0x8] sm:$0xff]  ;;  %v380_v31 = vlaneseq }
  0x1d   : > { %406 = vmatprep.subr.mxu0 %v361_v18  ;;  %1595 = vmatprep.subr.mxu1 %v611_v34  ;;  %v601_v52 = vld [vmem:[%s2368_s1] sm:$0xff]  ;;  %v335_v54 = vld [vmem:[%s1962_s24 + $0x28] sm:$0xff]  ;;  %v336_v55 = vld [vmem:[%s1962_s24 + $0x30] sm:$0xff] }
  0x1e   : > { %407 = vmatpush1.msra.mxu0 %v360_v19  ;;  %1596 = vmatpush3.msra.mxu1 %v611_v34  ;;  %v334_v53 = vld [vmem:[%s1962_s24 + $0x20] sm:$0xff]  ;;  %v337_v56 = vld [vmem:[%s1962_s24 + $0x38] sm:$0xff]  ;;  %v339_v58 = vld [vmem:[%s1962_s24 + $0x48] sm:$0xff]  ;;  %v381_v34 = vshrl.u32 %v380_v31, 7 }
  0x1f   : > { %408 = vmatprep.subr.mxu0 %v359_v20  ;;  %1597 = vmatprep.subr.mxu1 %v610_v37  ;;  %v338_v57 = vld [vmem:[%s1962_s24 + $0x40] sm:$0xff]  ;;  %v340_v59 = vld [vmem:[%s1962_s24 + $0x50] sm:$0xff]  ;;  %v341_v60 = vld [vmem:[%s1962_s24 + $0x58] sm:$0xff] }
  0x20   : > { %409 = vmatpush1.msra.mxu0 %v358_v23  ;;  %1598 = vmatpush3.msra.mxu1 %v610_v37  ;;  %v342_v61 = vld [vmem:[%s1962_s24 + $0x60] sm:$0xff]  ;;  %v343_v62 = vld [vmem:[%s1962_s24 + $0x68] sm:$0xff]  ;;  %v344_v63 = vld [vmem:[%s1962_s24 + $0x70] sm:$0xff]  ;;  %v382_v37 = vsub.s32 0, %v381_v34 }
  0x21   : > { %410 = vmatprep.subr.mxu0 %v357_v24  ;;  %1599 = vmatprep.subr.mxu1 %v609_v40  ;;  %v345_v0 = vld [vmem:[%s1962_s24 + $0x78] sm:$0xff] }
  0x22   : > { %411 = vmatpush1.msra.mxu0 %v356_v26  ;;  %1600 = vmatpush3.msra.mxu1 %v609_v40  ;;  %v386_v40 = vsub.s32 1, %v381_v34 }
  0x23   : > { %412 = vmatprep.subr.mxu0 %v355_v27  ;;  %1601 = vmatprep.subr.mxu1 %v608_v42 }
  0x24   : > { %413 = vmatpush1.msra.mxu0 %v354_v29  ;;  %1602 = vmatpush3.msra.mxu1 %v608_v42 }
  0x25   : > { %414 = vmatprep.subr.mxu0 %v353_v30  ;;  %1603 = vmatprep.subr.mxu1 %v607_v43 }
  0x26   : > { %415 = vmatpush1.msra.mxu0 %v352_v32  ;;  %1604 = vmatpush3.msra.mxu1 %v607_v43 }
  0x27   : > { %416 = vmatprep.subr.mxu0 %v351_v33  ;;  %1605 = vmatprep.subr.mxu1 %v606_v45 }
  0x28   : > { %417 = vmatpush1.msra.mxu0 %v350_v35  ;;  %1606 = vmatpush3.msra.mxu1 %v606_v45 }
  0x29   : > { %418 = vmatprep.subr.mxu0 %v349_v36  ;;  %1607 = vmatprep.subr.mxu1 %v605_v46 }
  0x2a   : > { %419 = vmatpush1.msra.mxu0 %v348_v38  ;;  %1608 = vmatpush3.msra.mxu1 %v605_v46  ;;  %v378_v38 = vld [vmem:[%s2371_s4] sm:$0x3] }
  0x2b   : > { %420 = vmatprep.subr.mxu0 %v347_v39  ;;  %1609 = vmatprep.subr.mxu1 %v604_v48  ;;  %v2159_v42 = vrot.slane %v378_v38, %v382_v37 }
  0x2c   : > { %421 = vmatpush1.msra.mxu0 %v346_v41  ;;  %1610 = vmatpush3.msra.mxu1 %v604_v48 }
  0x2d   : > { %455 = vmatmul.mubr.f32.vlgmr.msra.gmra.mxu0 %v1974_v14  ;;  %1611 = vmatprep.subr.mxu1 %v603_v49 }
  0x2e   : > { %460 = vmatprep.mubr.f32.mxu0 %v1866_v4  ;;  %1612 = vmatpush3.msra.mxu1 %v603_v49 }
  0x2f   : > { %1613 = vmatprep.subr.mxu1 %v602_v51 }
  0x30   : > { %1614 = vmatpush3.msra.mxu1 %v602_v51 }
  0x31   : > { %461 = vmatmul.mubr.f32.gmra.mxu0 %v331_v44  ;;  %1615 = vmatprep.subr.mxu1 %v601_v52 }
  0x32   : > { %466 = vmatprep.mubr.f32.mxu0 %v1866_v4  ;;  %1616 = vmatpush3.msra.mxu1 %v601_v52 }
  0x33   : > { %1618 = vmatmul.mubr.f32.vlgmr.msra.gmra.mxu1 %v331_v44  ;;  %v2161_v44 = vrot.slane %v378_v38, %v386_v40 }
  0x34   : > { %1620 = vmatprep.mubr.f32.mxu1 %v332_v47 }
  0x35   : > { %467 = vmatmul.mubr.f32.gmra.mxu0 %v332_v47 }
  0x36   : > { %472 = vmatprep.mubr.f32.mxu0 %v1866_v4 }
  0x37   : > { %1621 = vmatmul.mubr.f32.gmra.mxu1 %v333_v50 }
  0x38   : > { %1623 = vmatprep.mubr.f32.mxu1 %v334_v53 }
  0x39   : > { %473 = vmatmul.mubr.f32.gmra.mxu0 %v333_v50 }
  0x3a   : > { %478 = vmatprep.mubr.f32.mxu0 %v1866_v4 }
  0x3b   : > { %1624 = vmatmul.mubr.f32.gmra.mxu1 %v335_v54 }
  0x3c   : > { %1626 = vmatprep.mubr.f32.mxu1 %v336_v55 }
  0x3d   : > { %479 = vmatmul.mubr.f32.gmra.mxu0 %v334_v53 }
  0x3e   : > { %484 = vmatprep.mubr.f32.mxu0 %v1866_v4 }
  0x3f   : > { %1627 = vmatmul.mubr.f32.gmra.mxu1 %v337_v56 }
  0x40   : > { %1629 = vmatprep.mubr.f32.mxu1 %v338_v57 }
  0x41   : > { %485 = vmatmul.mubr.f32.gmra.mxu0 %v335_v54 }
  0x42   : > { %490 = vmatprep.mubr.f32.mxu0 %v1866_v4 }
  0x43   : > { %1630 = vmatmul.mubr.f32.gmra.mxu1 %v339_v58 }
  0x44   : > { %1632 = vmatprep.mubr.f32.mxu1 %v340_v59 }
  0x45   : > { %491 = vmatmul.mubr.f32.gmra.mxu0 %v336_v55 }
  0x46   : > { %496 = vmatprep.mubr.f32.mxu0 %v1866_v4 }
  0x47   : > { %1633 = vmatmul.mubr.f32.gmra.mxu1 %v341_v60 }
  0x48   : > { %1635 = vmatprep.mubr.f32.mxu1 %v342_v61 }
  0x49   : > { %497 = vmatmul.mubr.f32.gmra.mxu0 %v337_v56 }
  0x4a   : > { %502 = vmatprep.mubr.f32.mxu0 %v1866_v4 }
  0x4b   : > { %1636 = vmatmul.mubr.f32.gmra.mxu1 %v343_v62 }
  0x4c   : > { %1638 = vmatprep.mubr.f32.mxu1 %v344_v63 }
  0x4d   : > { %503 = vmatmul.mubr.f32.gmra.mxu0 %v338_v57 }
  0x4e   : > { %508 = vmatprep.mubr.f32.mxu0 %v1866_v4 }
  0x4f   : > { %1639 = vmatmul.mubr.f32.gmra.mxu1 %v345_v0 }
  0x51   : > { %509 = vmatmul.mubr.f32.gmra.mxu0 %v339_v58 }
  0x52   : > { %514 = vmatprep.mubr.f32.mxu0 %v1866_v4 }
  0x55   : > { %515 = vmatmul.mubr.f32.gmra.mxu0 %v340_v59 }
  0x56   : > { %520 = vmatprep.mubr.f32.mxu0 %v1866_v4 }
  0x59   : > { %521 = vmatmul.mubr.f32.gmra.mxu0 %v341_v60 }
  0x5a   : > { %526 = vmatprep.mubr.f32.mxu0 %v1866_v4 }
  0x5d   : > { %527 = vmatmul.mubr.f32.gmra.mxu0 %v342_v61 }
  0x5e   : > { %532 = vmatprep.mubr.f32.mxu0 %v1866_v4 }
  0x61   : > { %533 = vmatmul.mubr.f32.gmra.mxu0 %v343_v62 }
  0x62   : > { %538 = vmatprep.mubr.f32.mxu0 %v1866_v4 }
  0x65   : > { %539 = vmatmul.mubr.f32.gmra.mxu0 %v344_v63 }
  0x66   : > { %544 = vmatprep.mubr.f32.mxu0 %v1866_v4  ;;  %v2132_v4 = vld [vmem:[%s2369_s2] ss:$0 sm:$0xff] }
  0x69   : > { %545 = vmatmul.mubr.f32.gmra.mxu0 %v345_v0 }
  0xed   : > { %v2113_v1 = vpop.f32.mrf.mxu0 }
  0xef   : > { %v2115_v2 = vpop.f32.mrf.mxu0 }
  0xf1   : > { %v2117_v3 = vpop.f32.mrf.mxu0 }
  0xf3   : > { %v2119_v5 = vpop.f32.mrf.mxu0  ;;  %v1619_v11 = vpop.f32.mrf.mxu1 }
  0xf4   : > { %v2137_v12 = vadd.f32 %v1619_v11, %v2132_v4 }
  0xf5   : > { %v2121_v6 = vpop.f32.mrf.mxu0  ;;  %v690_v14 = vpop.f32.mrf.mxu1 }
  0xf6   : > { %v691_v15 = vadd.f32 %v2132_v4, %v690_v14 }
  0xf7   : > { %v2123_v7 = vpop.f32.mrf.mxu0 }
  0xf8   : > { %v769_v17 = vmul.f32 0.17677669, %v691_v15  ;;  %v471_v15 = vadd.f32 %v2123_v7, %v2161_v44 }
  0xf9   : > { %v2125_v8 = vpop.f32.mrf.mxu0 }
  0xfa   : > { %1673 = vmatprep.mubr.f32.mxu0 %v769_v17 }
  0xfb   : > { %v2127_v9 = vpop.f32.mrf.mxu0 }
  0xfc   : > { %v477_v11 = vadd.f32 %v2127_v9, %v2161_v44  ;;  %v1622_v9 = vpop.f32.mrf.mxu1 }
  0xfd   : > { %v2134_v10 = vpop.f32.mrf.mxu0  ;;  %v706_v31 = vadd.f32 %v1622_v9, %v2132_v4 }
  0xff   : > { %v2139_v13 = vpop.f32.mrf.mxu0  ;;  %v772_v34 = vmul.f32 0.17677669, %v706_v31 }
 0x100   : > { %v483_v0 = vadd.f32 %v2139_v13, %v2161_v44  ;;  %v465_v13 = vadd.f32 %v2119_v5, %v2161_v44 }
 0x101   : > { %v2142_v16 = vpop.f32.mrf.mxu0 }
 0x103   : > { %v2144_v18 = vpop.f32.mrf.mxu0 }
 0x104   : > { %v489_v62 = vadd.f32 %v2144_v18, %v2161_v44  ;;  %v459_v18 = vadd.f32 %v2115_v2, %v2161_v44  ;;  %v481_v2 = vadd.f32 %v2134_v10, %v2159_v42 }
 0x105   : > { %v2146_v19 = vpop.f32.mrf.mxu0 }
 0x106   : > { %v493_v7 = vadd.f32 %v2146_v19, %v2159_v42  ;;  %v475_v19 = vadd.f32 %v2125_v8, %v2159_v42 }
 0x107   : > { %v2148_v20 = vpop.f32.mrf.mxu0 }
 0x108   : > { %v495_v61 = vadd.f32 %v2148_v20, %v2161_v44  ;;  %v700_v20 = vpop.f32.mrf.mxu1 }
 0x109   : > { %v2150_v21 = vpop.f32.mrf.mxu0  ;;  %v701_v8 = vadd.f32 %v2132_v4, %v700_v20 }
 0x10a   : > { %v499_v17 = vadd.f32 %v2150_v21, %v2159_v42  ;;  %v1625_v5 = vpop.f32.mrf.mxu1  ;;  %v487_v21 = vadd.f32 %v2142_v16, %v2159_v42 }
 0x10b   : > { %v500_v22 = vpop.f32.mrf.mxu0 }
 0x10c   : > { %v501_v59 = vadd.f32 %v500_v22, %v2161_v44  ;;  %v710_v22 = vpop.f32.mrf.mxu1 }
 0x10d   : > { %v2152_v23 = vpop.f32.mrf.mxu0 }
 0x10e   : > { %v505_v14 = vadd.f32 %v2152_v23, %v2159_v42  ;;  %v1628_v23 = vpop.f32.mrf.mxu1 }
 0x10f   : > { %v506_v24 = vpop.f32.mrf.mxu0  ;;  %v726_v37 = vadd.f32 %v1628_v23, %v2132_v4 }
 0x110   : > { %v507_v58 = vadd.f32 %v506_v24, %v2161_v44  ;;  %v720_v24 = vpop.f32.mrf.mxu1 }
 0x111   : > { %v2154_v25 = vpop.f32.mrf.mxu0  ;;  %v776_v40 = vmul.f32 0.17677669, %v726_v37 }
 0x112   : > { %v511_v63 = vadd.f32 %v2154_v25, %v2159_v42  ;;  %v469_v25 = vadd.f32 %v2121_v6, %v2159_v42  ;;  %v1631_v16 = vpop.f32.mrf.mxu1  ;;  %v711_v6 = vadd.f32 %v2132_v4, %v710_v22 }
 0x113   : > { %v512_v26 = vpop.f32.mrf.mxu0 }
 0x114   : > { %v513_v56 = vadd.f32 %v512_v26, %v2161_v44  ;;  %v463_v26 = vadd.f32 %v2117_v3, %v2159_v42  ;;  %v730_v10 = vpop.f32.mrf.mxu1 }
 0x115   : > { %v516_v27 = vpop.f32.mrf.mxu0 }
 0x116   : > { %v517_v60 = vadd.f32 %v516_v27, %v2159_v42  ;;  %v457_v27 = vadd.f32 %v2113_v1, %v2159_v42  ;;  %v721_v1 = vadd.f32 %v2132_v4, %v720_v24 }
 0x117   : > { %v518_v28 = vpop.f32.mrf.mxu0 }
 0x118   : > { %v519_v55 = vadd.f32 %v518_v28, %v2161_v44  ;;  %v1634_v28 = vpop.f32.mrf.mxu1  ;;  %v775_v38 = vmul.f32 0.17677669, %v721_v1 }
 0x119   : > { %v522_v29 = vpop.f32.mrf.mxu0 }
 0x11a   : > { %v523_v57 = vadd.f32 %v522_v29, %v2159_v42  ;;  %v771_v29 = vmul.f32 0.17677669, %v701_v8  ;;  %v740_v3 = vpop.f32.mrf.mxu1 }
 0x11b   : > { %v524_v30 = vpop.f32.mrf.mxu0 }
 0x11c   : > { %v525_v53 = vadd.f32 %v524_v30, %v2161_v44  ;;  %v770_v30 = vmul.f32 0.17677669, %v2137_v12  ;;  %v731_v12 = vadd.f32 %v2132_v4, %v730_v10 }
 0x11d   : > { %v528_v32 = vpop.f32.mrf.mxu0 }
 0x11e   : > { %v529_v54 = vadd.f32 %v528_v32, %v2159_v42  ;;  %v716_v32 = vadd.f32 %v1625_v5, %v2132_v4 }
 0x11f   : > { %v530_v33 = vpop.f32.mrf.mxu0 }
 0x120   : > { %v531_v52 = vadd.f32 %v530_v33, %v2161_v44  ;;  %v773_v33 = vmul.f32 0.17677669, %v711_v6 }
 0x121   : > { %v534_v35 = vpop.f32.mrf.mxu0 }
 0x122   : > { %v535_v50 = vadd.f32 %v534_v35, %v2159_v42  ;;  %v1637_v35 = vpop.f32.mrf.mxu1 }
 0x123   : > { %v536_v36 = vpop.f32.mrf.mxu0 }
 0x124   : > { %v537_v51 = vadd.f32 %v536_v36, %v2161_v44  ;;  %v774_v36 = vmul.f32 0.17677669, %v716_v32 }
 0x125   : > { %v540_v39 = vpop.f32.mrf.mxu0 }
 0x126   : > { %v541_v47 = vadd.f32 %v540_v39, %v2159_v42  ;;  %v750_v39 = vpop.f32.mrf.mxu1 }
 0x127   : > { %v542_v41 = vpop.f32.mrf.mxu0 }
 0x128   : > { %v543_v49 = vadd.f32 %v542_v41, %v2161_v44  ;;  %v736_v41 = vadd.f32 %v1631_v16, %v2132_v4 }
 0x129   : > { %v546_v43 = vpop.f32.mrf.mxu0 }
 0x12a   : > { %v547_v45 = vadd.f32 %v546_v43, %v2159_v42  ;;  %v777_v42 = vmul.f32 0.17677669, %v731_v12  ;;  %v741_v43 = vadd.f32 %v2132_v4, %v740_v3 }
 0x12b   : > { %v548_v46 = vpop.f32.mrf.mxu0 }
 0x12c   : > { %v549_v48 = vadd.f32 %v548_v46, %v2161_v44  ;;  %1641 = vmatprep.subr.mxu0 %v547_v45  ;;  %v1640_v44 = vpop.f32.mrf.mxu1  ;;  %v746_v46 = vadd.f32 %v1634_v28, %v2132_v4 }
 0x12d   : > { %1642 = vmatpush3.xpose.msra.mxu0 %v547_v45  ;;  %v778_v45 = vmul.f32 0.17677669, %v736_v41 }
 0x12e   : > { %1643 = vmatprep.subr.mxu0 %v541_v47  ;;  %1697 = vmatprep.subr.mxu1 %v549_v48 }
 0x12f   : > { %1698 = vmatpush3.msra.mxu1 %v549_v48  ;;  %v751_v48 = vadd.f32 %v2132_v4, %v750_v39 }
 0x130   : > { %1699 = vmatprep.subr.mxu1 %v543_v49 }
 0x131   : > { %1644 = vmatpush3.xpose.msra.mxu0 %v541_v47  ;;  %1700 = vmatpush3.msra.mxu1 %v543_v49  ;;  %v779_v47 = vmul.f32 0.17677669, %v741_v43  ;;  %v760_v49 = vpop.f32.mrf.mxu1 }
 0x132   : > { %1645 = vmatprep.subr.mxu0 %v535_v50  ;;  %1701 = vmatprep.subr.mxu1 %v537_v51 }
 0x133   : > { %1702 = vmatpush3.msra.mxu1 %v537_v51  ;;  %v756_v51 = vadd.f32 %v1637_v35, %v2132_v4 }
 0x134   : > { %1703 = vmatprep.subr.mxu1 %v531_v52 }
 0x135   : > { %1646 = vmatpush3.xpose.msra.mxu0 %v535_v50  ;;  %1704 = vmatpush3.msra.mxu1 %v531_v52  ;;  %v780_v50 = vmul.f32 0.17677669, %v746_v46  ;;  %v781_v52 = vmul.f32 0.17677669, %v751_v48 }
 0x136   : > { %1647 = vmatprep.subr.mxu0 %v529_v54  ;;  %1705 = vmatprep.subr.mxu1 %v525_v53 }
 0x137   : > { %1706 = vmatpush3.msra.mxu1 %v525_v53  ;;  %v761_v53 = vadd.f32 %v2132_v4, %v760_v49 }
 0x138   : > { %1707 = vmatprep.subr.mxu1 %v519_v55 }
 0x139   : > { %1648 = vmatpush3.xpose.msra.mxu0 %v529_v54  ;;  %1708 = vmatpush3.msra.mxu1 %v519_v55  ;;  %v782_v54 = vmul.f32 0.17677669, %v756_v51  ;;  %v766_v55 = vadd.f32 %v1640_v44, %v2132_v4 }
 0x13a   : > { %1649 = vmatprep.subr.mxu0 %v523_v57  ;;  %1709 = vmatprep.subr.mxu1 %v513_v56 }
 0x13b   : > { %1710 = vmatpush3.msra.mxu1 %v513_v56  ;;  %v783_v56 = vmul.f32 0.17677669, %v761_v53 }
 0x13c   : > { %1711 = vmatprep.subr.mxu1 %v507_v58 }
 0x13d   : > { %1650 = vmatpush3.xpose.msra.mxu0 %v523_v57  ;;  %1712 = vmatpush3.msra.mxu1 %v507_v58  ;;  %v784_v57 = vmul.f32 0.17677669, %v766_v55 }
 0x13e   : > { %1651 = vmatprep.subr.mxu0 %v517_v60  ;;  %1713 = vmatprep.subr.mxu1 %v501_v59 }
 0x13f   : > { %1714 = vmatpush3.msra.mxu1 %v501_v59  ;;  %v1483_v59 = vld [vmem:[%s2372_s5] ss:$0 sm:$0xff] }
 0x140   : > { %1715 = vmatprep.subr.mxu1 %v495_v61 }
 0x141   : > { %1652 = vmatpush3.xpose.msra.mxu0 %v517_v60  ;;  %1716 = vmatpush3.msra.mxu1 %v495_v61 }
 0x142   : > { %1653 = vmatprep.subr.mxu0 %v511_v63  ;;  %1717 = vmatprep.subr.mxu1 %v489_v62 }
 0x143   : > { %1718 = vmatpush3.msra.mxu1 %v489_v62 }
 0x144   : > { %1719 = vmatprep.subr.mxu1 %v483_v0 }
 0x145   : > { %1654 = vmatpush3.xpose.msra.mxu0 %v511_v63  ;;  %1720 = vmatpush3.msra.mxu1 %v483_v0 }
 0x146   : > { %1655 = vmatprep.subr.mxu0 %v505_v14  ;;  %1721 = vmatprep.subr.mxu1 %v477_v11 }
 0x147   : > { %1722 = vmatpush3.msra.mxu1 %v477_v11 }
 0x148   : > { %1723 = vmatprep.subr.mxu1 %v471_v15 }
 0x149   : > { %1656 = vmatpush3.xpose.msra.mxu0 %v505_v14  ;;  %1724 = vmatpush3.msra.mxu1 %v471_v15 }
 0x14a   : > { %1657 = vmatprep.subr.mxu0 %v499_v17  ;;  %1725 = vmatprep.subr.mxu1 %v465_v13 }
 0x14b   : > { %1726 = vmatpush3.msra.mxu1 %v465_v13 }
 0x14c   : > { %1727 = vmatprep.subr.mxu1 %v459_v18 }
 0x14d   : > { %1658 = vmatpush3.xpose.msra.mxu0 %v499_v17  ;;  %1728 = vmatpush3.msra.mxu1 %v459_v18 }
 0x14e   : > { %1659 = vmatprep.subr.mxu0 %v493_v7 }
 0x151   : > { %1660 = vmatpush3.xpose.msra.mxu0 %v493_v7 }
 0x152   : > { %1661 = vmatprep.subr.mxu0 %v487_v21 }
 0x155   : > { %1662 = vmatpush3.xpose.msra.mxu0 %v487_v21 }
 0x156   : > { %1663 = vmatprep.subr.mxu0 %v481_v2 }
 0x159   : > { %1664 = vmatpush3.xpose.msra.mxu0 %v481_v2 }
 0x15a   : > { %1665 = vmatprep.subr.mxu0 %v475_v19 }
 0x15d   : > { %1666 = vmatpush3.xpose.msra.mxu0 %v475_v19 }
 0x15e   : > { %1667 = vmatprep.subr.mxu0 %v469_v25 }
 0x161   : > { %1668 = vmatpush3.xpose.msra.mxu0 %v469_v25 }
 0x162   : > { %1669 = vmatprep.subr.mxu0 %v463_v26 }
 0x165   : > { %1670 = vmatpush3.xpose.msra.mxu0 %v463_v26 }
 0x166   : > { %1671 = vmatprep.subr.mxu0 %v457_v27 }
 0x169   : > { %1672 = vmatpush3.xpose.msra.mxu0 %v457_v27 }
 0x16c   : > { %1674 = vmatmul.mubr.f32.vlgmr.msra.gmra.mxu0 %v770_v30 }
 0x16d   : > { %1676 = vmatprep.mubr.f32.mxu0 %v771_v29 }
 0x170   : > { %1677 = vmatmul.mubr.f32.gmra.mxu0 %v772_v34 }
 0x171   : > { %1679 = vmatprep.mubr.f32.mxu0 %v773_v33 }
 0x174   : > { %1680 = vmatmul.mubr.f32.gmra.mxu0 %v774_v36 }
 0x175   : > { %1682 = vmatprep.mubr.f32.mxu0 %v775_v38 }
 0x178   : > { %1683 = vmatmul.mubr.f32.gmra.mxu0 %v776_v40 }
 0x179   : > { %1685 = vmatprep.mubr.f32.mxu0 %v777_v42 }
 0x17c   : > { %1686 = vmatmul.mubr.f32.gmra.mxu0 %v778_v45 }
 0x17d   : > { %1688 = vmatprep.mubr.f32.mxu0 %v779_v47 }
 0x180   : > { %1689 = vmatmul.mubr.f32.gmra.mxu0 %v780_v50 }
 0x181   : > { %1691 = vmatprep.mubr.f32.mxu0 %v781_v52 }
 0x184   : > { %1692 = vmatmul.mubr.f32.gmra.mxu0 %v782_v54 }
 0x185   : > { %1694 = vmatprep.mubr.f32.mxu0 %v783_v56 }
 0x188   : > { %1695 = vmatmul.mubr.f32.gmra.mxu0 %v784_v57 }
 0x22c   : > { %v1675_v58 = vpop.f32.mrf.mxu0 }
 0x22d   : > { %v880_v0 = vadd.f32 %v1675_v58, %v1483_v59 }
 0x22e   : > { %v874_v60 = vpop.f32.mrf.mxu0 }
 0x22f   : > { %v875_v61 = vadd.f32 %v1483_v59, %v874_v60 }
 0x230   : > { %v1678_v62 = vpop.f32.mrf.mxu0 }
 0x231   : > { %953 = vmax.xlane.f32.xlu0 %v875_v61  ;;  %v890_v15 = vadd.f32 %v1678_v62, %v1483_v59 }
 0x232   : > { %v884_v63 = vpop.f32.mrf.mxu0 }
 0x233   : > { %v885_v11 = vadd.f32 %v1483_v59, %v884_v63 }
 0x234   : > { %v1681_v4 = vpop.f32.mrf.mxu0 }
 0x235   : > { %957 = vmax.xlane.f32.xlu1 %v885_v11  ;;  %955 = vmax.xlane.f32.xlu0 %v880_v0  ;;  %v900_v18 = vadd.f32 %v1681_v4, %v1483_v59 }
 0x236   : > { %v894_v14 = vpop.f32.mrf.mxu0 }
 0x237   : > { %v895_v13 = vadd.f32 %v1483_v59, %v894_v14 }
 0x238   : > { %v1684_v17 = vpop.f32.mrf.mxu0 }
 0x239   : > { %959 = vmax.xlane.f32.xlu1 %v890_v15  ;;  %961 = vmax.xlane.f32.xlu0 %v895_v13  ;;  %v910_v21 = vadd.f32 %v1684_v17, %v1483_v59 }
 0x23a   : > { %v904_v9 = vpop.f32.mrf.mxu0 }
 0x23b   : > { %v905_v7 = vadd.f32 %v1483_v59, %v904_v9 }
 0x23c   : > { %v1687_v20 = vpop.f32.mrf.mxu0 }
 0x23d   : > { %963 = vmax.xlane.f32.xlu1 %v900_v18  ;;  %965 = vmax.xlane.f32.xlu0 %v905_v7  ;;  %v920_v19 = vadd.f32 %v1687_v20, %v1483_v59 }
 0x23e   : > { %v914_v5 = vpop.f32.mrf.mxu0 }
 0x23f   : > { %v915_v22 = vadd.f32 %v1483_v59, %v914_v5 }
 0x240   : > { %v1690_v2 = vpop.f32.mrf.mxu0 }
 0x241   : > { %967 = vmax.xlane.f32.xlu1 %v910_v21  ;;  %969 = vmax.xlane.f32.xlu0 %v915_v22  ;;  %v2230_v26 = vadd.f32 %v1690_v2, %v1483_v59 }
 0x242   : > { %v924_v23 = vpop.f32.mrf.mxu0 }
 0x243   : > { %v925_v24 = vadd.f32 %v1483_v59, %v924_v23 }
 0x244   : > { %v1693_v25 = vpop.f32.mrf.mxu0 }
 0x245   : > { %971 = vmax.xlane.f32.xlu1 %v920_v19  ;;  %973 = vmax.xlane.f32.xlu0 %v925_v24  ;;  %v2236_v28 = vadd.f32 %v1693_v25, %v1483_v59 }
 0x246   : > { %v934_v16 = vpop.f32.mrf.mxu0 }
 0x247   : > { %v2232_v10 = vadd.f32 %v1483_v59, %v934_v16 }
 0x248   : > { %v1696_v27 = vpop.f32.mrf.mxu0 }
 0x249   : > { %975 = vmax.xlane.f32.xlu1 %v2230_v26  ;;  %977 = vmax.xlane.f32.xlu0 %v2232_v10  ;;  %v2242_v6 = vadd.f32 %v1696_v27, %v1483_v59 }
 0x24a   : > { %v944_v8 = vpop.f32.mrf.mxu0 }
 0x24b   : > { %v2238_v29 = vadd.f32 %v1483_v59, %v944_v8 }
 0x24d   : > { %979 = vmax.xlane.f32.xlu1 %v2236_v28  ;;  %981 = vmax.xlane.f32.xlu0 %v2238_v29 }
 0x251   : > { %983 = vmax.xlane.f32.xlu1 %v2242_v6 }
 0x2ba   : > { %v954_v30 = vpop.xlane.xlu0 %953 }
 0x2bb   : > { %v985_v31 = vsub.f32 %v875_v61, %v954_v30 }
 0x2bd   : > { %v1001_v3 = vmul.f32 1.442695, %v985_v31 }
 0x2be   : > { %v958_v32 = vpop.xlane.xlu1 %957  ;;  %v956_v33 = vpop.xlane.xlu0 %955 }
 0x2bf   : > { %1778 = vpow2.f32 %v1001_v3  ;;  %v987_v1 = vsub.f32 %v885_v11, %v958_v32  ;;  %v986_v34 = vsub.f32 %v880_v0, %v956_v33 }
 0x2c1   : > { %v1005_v35 = vmul.f32 1.442695, %v987_v1  ;;  %v1003_v36 = vmul.f32 1.442695, %v986_v34 }
 0x2c2   : > { %v960_v37 = vpop.xlane.xlu1 %959  ;;  %v962_v38 = vpop.xlane.xlu0 %961 }
 0x2c3   : > { %1780 = vpow2.f32 %v1005_v35  ;;  %v988_v12 = vsub.f32 %v890_v15, %v960_v37  ;;  %v989_v39 = vsub.f32 %v895_v13, %v962_v38 }
 0x2c4   : > { %1782 = vpow2.f32 %v1003_v36 }
 0x2c5   : > { %v1007_v40 = vmul.f32 1.442695, %v988_v12  ;;  %v1009_v41 = vmul.f32 1.442695, %v989_v39 }
 0x2c6   : > { %v964_v42 = vpop.xlane.xlu1 %963  ;;  %v966_v43 = vpop.xlane.xlu0 %965 }
 0x2c7   : > { %1784 = vpow2.f32 %v1007_v40  ;;  %v990_v44 = vsub.f32 %v900_v18, %v964_v42  ;;  %v991_v45 = vsub.f32 %v905_v7, %v966_v43 }
 0x2c8   : > { %1786 = vpow2.f32 %v1009_v41 }
 0x2c9   : > { %v1011_v46 = vmul.f32 1.442695, %v990_v44  ;;  %v1013_v47 = vmul.f32 1.442695, %v991_v45 }
 0x2ca   : > { %v968_v48 = vpop.xlane.xlu1 %967  ;;  %v970_v49 = vpop.xlane.xlu0 %969 }
 0x2cb   : > { %1788 = vpow2.f32 %v1011_v46  ;;  %v992_v50 = vsub.f32 %v910_v21, %v968_v48  ;;  %v993_v51 = vsub.f32 %v915_v22, %v970_v49 }
 0x2cc   : > { %v2245_v52 = vpop.eup %1778  ;;  %1790 = vpow2.f32 %v1013_v47 }
 0x2cd   : > { %v1015_v53 = vmul.f32 1.442695, %v992_v50  ;;  %v1017_v54 = vmul.f32 1.442695, %v993_v51  ;;  %1033 = vadd.xlane.f32.xlu0 %v2245_v52 }
 0x2ce   : > { %v972_v55 = vpop.xlane.xlu1 %971  ;;  %v974_v56 = vpop.xlane.xlu0 %973 }
 0x2cf   : > { %1792 = vpow2.f32 %v1015_v53  ;;  %v994_v57 = vsub.f32 %v920_v19, %v972_v55  ;;  %v995_v58 = vsub.f32 %v925_v24, %v974_v56 }
 0x2d0   : > { %v2248_v59 = vpop.eup %1780  ;;  %1794 = vpow2.f32 %v1017_v54 }
 0x2d1   : > { %v2250_v60 = vpop.eup %1782  ;;  %v1019_v61 = vmul.f32 1.442695, %v994_v57  ;;  %v1021_v62 = vmul.f32 1.442695, %v995_v58  ;;  %1037 = vadd.xlane.f32.xlu0 %v2248_v59 }
 0x2d2   : > { %1035 = vadd.xlane.f32.xlu1 %v2250_v60  ;;  %v976_v63 = vpop.xlane.xlu1 %975  ;;  %v978_v0 = vpop.xlane.xlu0 %977 }
 0x2d3   : > { %1796 = vpow2.f32 %v1019_v61  ;;  %v996_v11 = vsub.f32 %v2230_v26, %v976_v63  ;;  %v997_v4 = vsub.f32 %v2232_v10, %v978_v0 }
 0x2d4   : > { %v2256_v14 = vpop.eup %1784  ;;  %1798 = vpow2.f32 %v1021_v62 }
 0x2d5   : > { %v2258_v15 = vpop.eup %1786  ;;  %v1023_v13 = vmul.f32 1.442695, %v996_v11  ;;  %v1025_v17 = vmul.f32 1.442695, %v997_v4 }
 0x2d6   : > { %1039 = vadd.xlane.f32.xlu1 %v2256_v14  ;;  %1041 = vadd.xlane.f32.xlu0 %v2258_v15  ;;  %v980_v9 = vpop.xlane.xlu1 %979  ;;  %v982_v18 = vpop.xlane.xlu0 %981 }
 0x2d7   : > { %1800 = vpow2.f32 %v1023_v13  ;;  %v998_v7 = vsub.f32 %v2236_v28, %v980_v9  ;;  %v999_v20 = vsub.f32 %v2238_v29, %v982_v18 }
 0x2d8   : > { %v2264_v5 = vpop.eup %1788  ;;  %1802 = vpow2.f32 %v1025_v17 }
 0x2d9   : > { %v2266_v21 = vpop.eup %1790  ;;  %v1027_v22 = vmul.f32 1.442695, %v998_v7  ;;  %v1029_v2 = vmul.f32 1.442695, %v999_v20 }
 0x2da   : > { %1043 = vadd.xlane.f32.xlu1 %v2264_v5  ;;  %1045 = vadd.xlane.f32.xlu0 %v2266_v21  ;;  %v984_v23 = vpop.xlane.xlu1 %983 }
 0x2db   : > { %1804 = vpow2.f32 %v1027_v22  ;;  %v1000_v19 = vsub.f32 %v2242_v6, %v984_v23 }
 0x2dc   : > { %v2271_v24 = vpop.eup %1792  ;;  %1806 = vpow2.f32 %v1029_v2 }
 0x2dd   : > { %v2273_v25 = vpop.eup %1794  ;;  %v1031_v16 = vmul.f32 1.442695, %v1000_v19 }
 0x2de   : > { %1047 = vadd.xlane.f32.xlu1 %v2271_v24  ;;  %1049 = vadd.xlane.f32.xlu0 %v2273_v25 }
 0x2df   : > { %1808 = vpow2.f32 %v1031_v16 }
 0x2e0   : > { %v2277_v26 = vpop.eup %1796 }
 0x2e1   : > { %v2279_v10 = vpop.eup %1798 }
 0x2e2   : > { %1051 = vadd.xlane.f32.xlu1 %v2277_v26  ;;  %1053 = vadd.xlane.f32.xlu0 %v2279_v10 }
 0x2e4   : > { %v2283_v27 = vpop.eup %1800 }
 0x2e5   : > { %v2285_v8 = vpop.eup %1802 }
 0x2e6   : > { %1055 = vadd.xlane.f32.xlu1 %v2283_v27  ;;  %1057 = vadd.xlane.f32.xlu0 %v2285_v8 }
 0x2e8   : > { %v2289_v28 = vpop.eup %1804 }
 0x2e9   : > { %v2291_v29 = vpop.eup %1806 }
 0x2ea   : > { %1059 = vadd.xlane.f32.xlu1 %v2289_v28  ;;  %1061 = vadd.xlane.f32.xlu0 %v2291_v29 }
 0x2ec   : > { %v2295_v6 = vpop.eup %1808 }
 0x2ee   : > { %1063 = vadd.xlane.f32.xlu1 %v2295_v6 }
 0x356   : > { %v1034_v30 = vpop.xlane.xlu0 %1033 }
 0x357   : > { %1810 = vrcp.f32 %v1034_v30 }
 0x35a   : > { %v1038_v31 = vpop.xlane.xlu0 %1037 }
 0x35b   : > { %v1036_v3 = vpop.xlane.xlu1 %1035  ;;  %1812 = vrcp.f32 %v1038_v31 }
 0x35c   : > { %1814 = vrcp.f32 %v1036_v3 }
 0x35f   : > { %v1040_v32 = vpop.xlane.xlu1 %1039  ;;  %v1042_v33 = vpop.xlane.xlu0 %1041 }
 0x360   : > { %1816 = vrcp.f32 %v1040_v32 }
 0x361   : > { %1818 = vrcp.f32 %v1042_v33 }
 0x363   : > { %v1044_v1 = vpop.xlane.xlu1 %1043  ;;  %v1046_v34 = vpop.xlane.xlu0 %1045 }
 0x364   : > { %v1811_v35 = vpop.eup %1810  ;;  %1820 = vrcp.f32 %v1044_v1 }
 0x365   : > { %v1081_v36 = vmul.f32 %v1811_v35, %v1034_v30  ;;  %1822 = vrcp.f32 %v1046_v34 }
 0x367   : > { %v1097_v37 = vsub.f32 2.0, %v1081_v36  ;;  %v1048_v38 = vpop.xlane.xlu1 %1047  ;;  %v1050_v12 = vpop.xlane.xlu0 %1049 }
 0x368   : > { %v1813_v39 = vpop.eup %1812  ;;  %1824 = vrcp.f32 %v1048_v38 }
 0x369   : > { %v1815_v40 = vpop.eup %1814  ;;  %v1113_v41 = vmul.f32 %v1811_v35, %v1097_v37  ;;  %v1083_v42 = vmul.f32 %v1813_v39, %v1038_v31  ;;  %1826 = vrcp.f32 %v1050_v12 }
 0x36a   : > { %v1082_v43 = vmul.f32 %v1815_v40, %v1036_v3 }
 0x36b   : > { %v1099_v44 = vsub.f32 2.0, %v1083_v42  ;;  %v1052_v45 = vpop.xlane.xlu1 %1051  ;;  %v1054_v46 = vpop.xlane.xlu0 %1053  ;;  %v1129_v47 = vmul.f32 %v2245_v52, %v1113_v41 }
 0x36c   : > { %v1098_v48 = vsub.f32 2.0, %v1082_v43  ;;  %1828 = vrcp.f32 %v1052_v45 }
 0x36d   : > { %v1817_v49 = vpop.eup %1816  ;;  %v1115_v50 = vmul.f32 %v1813_v39, %v1099_v44  ;;  %1830 = vrcp.f32 %v1054_v46  ;;  %1729 = vmatprep.mubr.f32.mxu1 %v1129_v47  ;;  %1322 = vst [vmem:[%s2302_s21] sm:$0xff] %v1129_v47 }
 0x36e   : > { %v1819_v51 = vpop.eup %1818  ;;  %v1114_v53 = vmul.f32 %v1815_v40, %v1098_v48  ;;  %v1084_v54 = vmul.f32 %v1817_v49, %v1040_v32 }
 0x36f   : > { %v1085_v55 = vmul.f32 %v1819_v51, %v1042_v33  ;;  %v1056_v56 = vpop.xlane.xlu1 %1055  ;;  %v1058_v57 = vpop.xlane.xlu0 %1057  ;;  %v1131_v58 = vmul.f32 %v2248_v59, %v1115_v50 }
 0x370   : > { %v1130_v61 = vmul.f32 %v2250_v60, %v1114_v53  ;;  %v1100_v52 = vsub.f32 2.0, %v1084_v54  ;;  %1832 = vrcp.f32 %v1056_v56 }
 0x371   : > { %v1821_v62 = vpop.eup %1820  ;;  %v1101_v63 = vsub.f32 2.0, %v1085_v55  ;;  %1834 = vrcp.f32 %v1058_v57  ;;  %1324 = vst [vmem:[%s2302_s21 + $0x10] sm:$0xff] %v1131_v58 }
 0x372   : > { %v1823_v0 = vpop.eup %1822  ;;  %1323 = vst [vmem:[%s2302_s21 + $0x8] sm:$0xff] %v1130_v61  ;;  %v1116_v11 = vmul.f32 %v1817_v49, %v1100_v52  ;;  %v1086_v4 = vmul.f32 %v1821_v62, %v1044_v1  ;;  %1730 = vmatmul.mubr.f32.vlgmr.msra.gmra.mxu1 %v1130_v61 }
 0x373   : > { %v1117_v13 = vmul.f32 %v1819_v51, %v1101_v63  ;;  %v1087_v17 = vmul.f32 %v1823_v0, %v1046_v34  ;;  %v1060_v9 = vpop.xlane.xlu1 %1059  ;;  %1732 = vmatprep.mubr.f32.mxu1 %v1131_v58  ;;  %v1062_v18 = vpop.xlane.xlu0 %1061 }
 0x374   : > { %v1102_v59 = vsub.f32 2.0, %v1086_v4  ;;  %1836 = vrcp.f32 %v1060_v9  ;;  %v1132_v60 = vmul.f32 %v2256_v14, %v1116_v11 }
 0x375   : > { %v1825_v7 = vpop.eup %1824  ;;  %v1103_v20 = vsub.f32 2.0, %v1087_v17  ;;  %1838 = vrcp.f32 %v1062_v18  ;;  %v1133_v22 = vmul.f32 %v2258_v15, %v1117_v13 }
 0x376   : > { %v1827_v2 = vpop.eup %1826  ;;  %v1118_v23 = vmul.f32 %v1821_v62, %v1102_v59  ;;  %v1088_v19 = vmul.f32 %v1825_v7, %v1048_v38  ;;  %1733 = vmatmul.mubr.f32.gmra.mxu1 %v1132_v60  ;;  %1325 = vst [vmem:[%s2302_s21 + $0x18] sm:$0xff] %v1132_v60 }
 0x377   : > { %v1119_v16 = vmul.f32 %v1823_v0, %v1103_v20  ;;  %v1089_v30 = vmul.f32 %v1827_v2, %v1050_v12  ;;  %v1064_v31 = vpop.xlane.xlu1 %1063  ;;  %1735 = vmatprep.mubr.f32.mxu1 %v1133_v22  ;;  %1326 = vst [vmem:[%s2302_s21 + $0x20] sm:$0xff] %v1133_v22 }
 0x378   : > { %v1104_v3 = vsub.f32 2.0, %v1088_v19  ;;  %1840 = vrcp.f32 %v1064_v31  ;;  %v1134_v14 = vmul.f32 %v2264_v5, %v1118_v23 }
 0x379   : > { %v1829_v32 = vpop.eup %1828  ;;  %v1105_v33 = vsub.f32 2.0, %v1089_v30  ;;  %v1135_v15 = vmul.f32 %v2266_v21, %v1119_v16 }
 0x37a   : > { %v1831_v1 = vpop.eup %1830  ;;  %v1120_v34 = vmul.f32 %v1825_v7, %v1104_v3  ;;  %v1090_v35 = vmul.f32 %v1829_v32, %v1052_v45  ;;  %1736 = vmatmul.mubr.f32.gmra.mxu1 %v1134_v14  ;;  %1327 = vst [vmem:[%s2302_s21 + $0x28] sm:$0xff] %v1134_v14 }
 0x37b   : > { %v1121_v36 = vmul.f32 %v1827_v2, %v1105_v33  ;;  %v1091_v37 = vmul.f32 %v1831_v1, %v1054_v46  ;;  %1738 = vmatprep.mubr.f32.mxu1 %v1135_v15  ;;  %1328 = vst [vmem:[%s2302_s21 + $0x30] sm:$0xff] %v1135_v15 }
 0x37c   : > { %v1106_v38 = vsub.f32 2.0, %v1090_v35  ;;  %v1136_v12 = vmul.f32 %v2271_v24, %v1120_v34 }
 0x37d   : > { %v1833_v39 = vpop.eup %1832  ;;  %v1107_v5 = vsub.f32 2.0, %v1091_v37  ;;  %v1137_v40 = vmul.f32 %v2273_v25, %v1121_v36 }
 0x37e   : > { %v1835_v41 = vpop.eup %1834  ;;  %v1122_v21 = vmul.f32 %v1829_v32, %v1106_v38  ;;  %v1092_v42 = vmul.f32 %v1833_v39, %v1056_v56  ;;  %1739 = vmatmul.mubr.f32.gmra.mxu1 %v1136_v12  ;;  %1329 = vst [vmem:[%s2302_s21 + $0x38] sm:$0xff] %v1136_v12 }
 0x37f   : > { %v1123_v43 = vmul.f32 %v1831_v1, %v1107_v5  ;;  %v1093_v44 = vmul.f32 %v1835_v41, %v1058_v57  ;;  %1741 = vmatprep.mubr.f32.mxu1 %v1137_v40  ;;  %1330 = vst [vmem:[%s2302_s21 + $0x40] sm:$0xff] %v1137_v40 }
 0x380   : > { %v1108_v45 = vsub.f32 2.0, %v1092_v42  ;;  %v1138_v46 = vmul.f32 %v2277_v26, %v1122_v21 }
 0x381   : > { %v1837_v47 = vpop.eup %1836  ;;  %v1109_v24 = vsub.f32 2.0, %v1093_v44  ;;  %v1139_v48 = vmul.f32 %v2279_v10, %v1123_v43 }
 0x382   : > { %v1839_v49 = vpop.eup %1838  ;;  %v1124_v25 = vmul.f32 %v1833_v39, %v1108_v45  ;;  %v1094_v50 = vmul.f32 %v1837_v47, %v1060_v9  ;;  %1742 = vmatmul.mubr.f32.gmra.mxu1 %v1138_v46  ;;  %1331 = vst [vmem:[%s2302_s21 + $0x48] sm:$0xff] %v1138_v46 }
 0x383   : > { %v1125_v51 = vmul.f32 %v1835_v41, %v1109_v24  ;;  %v1095_v53 = vmul.f32 %v1839_v49, %v1062_v18  ;;  %1744 = vmatprep.mubr.f32.mxu1 %v1139_v48  ;;  %1332 = vst [vmem:[%s2302_s21 + $0x50] sm:$0xff] %v1139_v48 }
 0x384   : > { %v1110_v54 = vsub.f32 2.0, %v1094_v50  ;;  %v1140_v55 = vmul.f32 %v2283_v27, %v1124_v25 }
 0x385   : > { %v1841_v26 = vpop.eup %1840  ;;  %v1111_v56 = vsub.f32 2.0, %v1095_v53  ;;  %v1141_v10 = vmul.f32 %v2285_v8, %v1125_v51 }
 0x386   : > { %v1126_v57 = vmul.f32 %v1837_v47, %v1110_v54  ;;  %v1096_v58 = vmul.f32 %v1841_v26, %v1064_v31  ;;  %1745 = vmatmul.mubr.f32.gmra.mxu1 %v1140_v55  ;;  %1333 = vst [vmem:[%s2302_s21 + $0x58] sm:$0xff] %v1140_v55 }
 0x387   : > { %v1127_v61 = vmul.f32 %v1839_v49, %v1111_v56  ;;  %1747 = vmatprep.mubr.f32.mxu1 %v1141_v10  ;;  %1334 = vst [vmem:[%s2302_s21 + $0x60] sm:$0xff] %v1141_v10 }
 0x388   : > { %v1112_v52 = vsub.f32 2.0, %v1096_v58  ;;  %v1142_v62 = vmul.f32 %v2289_v28, %v1126_v57 }
 0x389   : > { %v1143_v27 = vmul.f32 %v2291_v29, %v1127_v61 }
 0x38a   : > { %v1128_v63 = vmul.f32 %v1841_v26, %v1112_v52  ;;  %1748 = vmatmul.mubr.f32.gmra.mxu1 %v1142_v62  ;;  %1335 = vst [vmem:[%s2302_s21 + $0x68] sm:$0xff] %v1142_v62 }
 0x38b   : > { %1750 = vmatprep.mubr.f32.mxu1 %v1143_v27  ;;  %1336 = vst [vmem:[%s2302_s21 + $0x70] sm:$0xff] %v1143_v27 }
 0x38c   : > { %v1144_v8 = vmul.f32 %v2295_v6, %v1128_v63 }
 0x38e   : > { %1751 = vmatmul.mubr.f32.gmra.mxu1 %v1144_v8  ;;  %1337 = vst [vmem:[%s2302_s21 + $0x78] sm:$0xff] %v1144_v8 }
 0x432   : > { %v1731_v28 = vpop.f32.mrf.mxu1 }
 0x433   : > { %1307 = vst [vmem:[%s2340_s28 + $0x8] sm:$0xff] %v1731_v28 }
 0x434   : > { %v1227_v29 = vpop.f32.mrf.mxu1 }
 0x435   : > { %1306 = vst [vmem:[%s2340_s28] sm:$0xff] %v1227_v29 }
 0x436   : > { %v1734_v6 = vpop.f32.mrf.mxu1 }
 0x437   : > { %1309 = vst [vmem:[%s2340_s28 + $0x18] sm:$0xff] %v1734_v6 }
 0x438   : > { %v1237_v0 = vpop.f32.mrf.mxu1 }
 0x439   : > { %1308 = vst [vmem:[%s2340_s28 + $0x10] sm:$0xff] %v1237_v0 }
 0x43a   : > { %v1737_v11 = vpop.f32.mrf.mxu1 }
 0x43b   : > { %1311 = vst [vmem:[%s2340_s28 + $0x28] sm:$0xff] %v1737_v11 }
 0x43c   : > { %v1247_v4 = vpop.f32.mrf.mxu1 }
 0x43d   : > { %1310 = vst [vmem:[%s2340_s28 + $0x20] sm:$0xff] %v1247_v4 }
 0x43e   : > { %v1740_v13 = vpop.f32.mrf.mxu1 }
 0x43f   : > { %1313 = vst [vmem:[%s2340_s28 + $0x38] sm:$0xff] %v1740_v13 }
 0x440   : > { %v1257_v17 = vpop.f32.mrf.mxu1 }
 0x441   : > { %1312 = vst [vmem:[%s2340_s28 + $0x30] sm:$0xff] %v1257_v17 }
 0x442   : > { %v1743_v9 = vpop.f32.mrf.mxu1 }
 0x443   : > { %1315 = vst [vmem:[%s2340_s28 + $0x48] sm:$0xff] %v1743_v9 }
 0x444   : > { %v1267_v18 = vpop.f32.mrf.mxu1 }
 0x445   : > { %1314 = vst [vmem:[%s2340_s28 + $0x40] sm:$0xff] %v1267_v18 }
 0x446   : > { %v1746_v59 = vpop.f32.mrf.mxu1 }
 0x447   : > { %1317 = vst [vmem:[%s2340_s28 + $0x58] sm:$0xff] %v1746_v59 }
 0x448   : > { %v1277_v60 = vpop.f32.mrf.mxu1 }
 0x449   : > { %1316 = vst [vmem:[%s2340_s28 + $0x50] sm:$0xff] %v1277_v60 }
 0x44a   : > { %v1749_v7 = vpop.f32.mrf.mxu1 }
 0x44b   : > { %1319 = vst [vmem:[%s2340_s28 + $0x68] sm:$0xff] %v1749_v7 }
 0x44c   : > { %v1287_v20 = vpop.f32.mrf.mxu1 }
 0x44d   : > { %1318 = vst [vmem:[%s2340_s28 + $0x60] sm:$0xff] %v1287_v20 }
 0x44e   : > { %v1752_v22 = vpop.f32.mrf.mxu1 }
 0x44f   : > { %1321 = vst [vmem:[%s2340_s28 + $0x78] sm:$0xff] %v1752_v22 }
 0x450   : > { %v1297_v2 = vpop.f32.mrf.mxu1 }
 0x451   : > { %1320 = vst [vmem:[%s2340_s28 + $0x70] sm:$0xff] %v1297_v2 }
 0x452 PF: > { %s18_s26 = sadd.s32 1, %s1864_s26   ;;  %s2375_s24 = smov %s1860_s25 }
 0x453   : > { %p15_p5 = scmp.ge.s32.totalorder %s18_s26, 4   ;;  %s2376_s25 = smov %s2378_s27 }
 0x455   :  { %17 = sbr.rel (!%p15_p5) target bundleno = 2 (0x2), region = 91 }

</bundles_post_ra>
